<compile_context>
chip_gen: v7x
topology: tpu7x:2x2x1
jax: 0.10.0
libtpu: 0.0.40
codegen_flags: <defaults>
</compile_context>

<pallas_src>
import jax
import jax.numpy as jnp
from jax.experimental import pallas as pl
from jax.experimental.pallas import tpu as pltpu


def rnn_kernel(emb_ref, w_ref, out_ref, xg_ref):
    # emb_ref: (B*S, E)  embeddings in natural (B, S, E) layout, rows = (b, s)
    # w_ref  : (E+8+3G+H, E) packed weight slab (single DMA)
    # out_ref: (1, B)    per-sequence scalar outputs (single lane-dense store)
    # xg_ref : (B*G, E)  VMEM scratch staging the hoisted input projections
    _, B = out_ref.shape
    BS, E = emb_ref.shape
    S = BS // B
    BG, _ = xg_ref.shape
    G = BG // B                      # 4*H, gates fused on the sublane axis
    H = G // 4

    # ---- unpack the weight slab (static, vreg-aligned row offsets) ----
    r = 0
    w0t = w_ref[r:r + E, :]          # (E, E)   fc0 weight, pre-transposed
    r += E
    b0 = w_ref[r:r + 1, :]           # (1, E)   fc0 bias (sublane broadcast)
    r += 8
    wih = w_ref[r:r + G, 0:S]        # (4H, S)  fused LSTM W_ih, rows [i,f,o,g]
    r += G
    whh = w_ref[r:r + G, 0:H]        # (4H, H)  fused LSTM W_hh, rows [i,f,o,g]
    r += G
    bias = w_ref[r:r + G, 0:1]       # (4H, 1)  b_ih + b_hh (lane broadcast)
    r += G
    weh = w_ref[r:r + H, :]          # (H, E)   fused fc1/fc2 = outer(w1, w2)

    # ---- fc0 + ReLU for every (b, s) row in a single MXU matmul ----
    z = jnp.maximum(
        jnp.dot(emb_ref[...], w0t, preferred_element_type=jnp.float32) + b0,
        0.0)                                                 # (B*S, E)

    # ---- input-to-hidden projection hoisted out of the recurrence,
    #      staged into VMEM scratch to bound its live range ----
    for b in range(B):                                       # static, tiny
        zb = z[b * S:(b + 1) * S, :]                         # (S, E) aligned
        xg_ref[b * G:(b + 1) * G, :] = (
            jnp.dot(wih, zb, preferred_element_type=jnp.float32) + bias)

    # ---- serial LSTM recurrence over the B ("time") axis ----
    lane = jax.lax.broadcasted_iota(jnp.int32, (1, B), 1)
    h = jnp.zeros((H, E), jnp.float32)                       # transposed state
    c = jnp.zeros((H, E), jnp.float32)
    out_vec = jnp.zeros((1, B), jnp.float32)
    for t in range(B):
        gates = xg_ref[t * G:(t + 1) * G, :] + jnp.dot(
            whh, h, preferred_element_type=jnp.float32)      # (4H, E), 1 MXU op
        sfo = jax.nn.sigmoid(gates[0:3 * H, :])              # fused i/f/o
        g_g = jnp.tanh(gates[3 * H:4 * H, :])                # exact tanh for g
        i_g = sfo[0:H, :]
        f_g = sfo[H:2 * H, :]
        o_g = sfo[2 * H:3 * H, :]
        c = f_g * c + i_g * g_g
        h = o_g * jnp.tanh(c)

        # fused fc1 -> fc2 readout: out[t] = sum_{h,e} h[h,e]*w1[h]*w2[e]
        rsum = jnp.sum(h * weh, axis=0, keepdims=True)       # (1, E)
        s = jnp.sum(rsum, axis=1, keepdims=True)             # (1, 1)
        out_vec = out_vec + jnp.where(lane == t, s, 0.0)

    out_ref[...] = out_vec                                   # lane-dense store


def _full_spec(shape):
    nd = len(shape)
    return pl.BlockSpec(shape, lambda i, _nd=nd: (0,) * _nd)


def make_params(key, vocab, E, S):
    ks = jax.random.split(key, 10)
    s = 0.1
    return {
        "emb_table": jax.random.normal(ks[0], (vocab, E), jnp.float32),
        "w0": jax.random.normal(ks[1], (E, E), jnp.float32) * s,
        "b0": jax.random.normal(ks[2], (E,), jnp.float32) * s,
        "wih": jax.random.normal(ks[3], (4 * S, S), jnp.float32) * s,
        "whh": jax.random.normal(ks[4], (4 * S, S), jnp.float32) * s,
        "bih": jax.random.normal(ks[5], (4 * S,), jnp.float32) * s,
        "bhh": jax.random.normal(ks[6], (4 * S,), jnp.float32) * s,
        "w1": jax.random.normal(ks[7], (1, S), jnp.float32) * s,
        "b1": jax.random.normal(ks[8], (1,), jnp.float32) * s,
        "w2": jax.random.normal(ks[9], (1, E), jnp.float32) * s,
        "b2": jnp.array([0.05], jnp.float32),
    }


def rnn_forward(token_ids, p):
    B, S = token_ids.shape
    E = p["emb_table"].shape[1]
    H = S                                   # hidden_size == input_len
    G = 4 * H
    assert E >= max(S, H), "weight-slab packing assumes emb_dim >= input_len"

    # ---- plain-JAX glue: gather + free layout plumbing (all in wrapper) ----
    emb = jnp.take(p["emb_table"], token_ids, axis=0)        # (B, S, E)
    # TODO(synk): nn.Dropout2d(p=0.2) is stochastic training-time masking; eval-mode identity here.
    emb_flat = emb.reshape(B * S, E)                         # natural layout

    def reorder(w):   # PyTorch gate rows [i, f, g, o] -> [i, f, o, g]
        return jnp.concatenate([w[0:2 * H], w[3 * H:4 * H], w[2 * H:3 * H]], 0)

    def pad_c(x):     # zero-pad last dim to slab width E
        return jnp.pad(x, ((0, 0), (0, E - x.shape[1])))

    w0t = p["w0"].T                                          # (E, E)
    b0_row = p["b0"].reshape(1, E)
    wih_r = reorder(p["wih"])                                # (4H, S)
    whh_r = reorder(p["whh"])                                # (4H, H)
    bias_r = reorder((p["bih"] + p["bhh"]).reshape(G, 1))    # (4H, 1)
    weh_t = p["w1"].reshape(H, 1) * p["w2"].reshape(1, E)    # (H, E) fused fc1/fc2
    out_const = p["b1"][0] * jnp.sum(p["w2"]) + p["b2"][0]   # folded fc biases

    # single packed weight slab -> one DMA, static 8-row-aligned offsets
    wslab = jnp.concatenate([
        w0t,                                  # rows [0, E)
        jnp.pad(b0_row, ((0, 7), (0, 0))),    # rows [E, E+8)
        pad_c(wih_r),                         # rows [E+8, E+8+G)
        pad_c(whh_r),                         # rows [E+8+G, E+8+2G)
        pad_c(bias_r),                        # rows [E+8+2G, E+8+3G)
        weh_t,                                # rows [E+8+3G, E+8+3G+H)
    ], axis=0)                                # (E+8+3G+H, E)

    out = pl.pallas_call(
        rnn_kernel,
        out_shape=jax.ShapeDtypeStruct((1, B), jnp.float32),
        grid=(1,),
        in_specs=[_full_spec(emb_flat.shape), _full_spec(wslab.shape)],
        out_specs=_full_spec((1, B)),
        scratch_shapes=[pltpu.VMEM((B * G, E), jnp.float32)],
        compiler_params=pltpu.CompilerParams(
            dimension_semantics=("arbitrary",)),
    )(emb_flat, wslab)
    return jnp.squeeze(out) + out_const                      # (B,), like torch.squeeze


def rnn_reference(token_ids, p):
    """Pure-JAX reference mirroring the PyTorch module (for a sanity check)."""
    B, S = token_ids.shape
    E = p["emb_table"].shape[1]
    H = S
    emb = jnp.take(p["emb_table"], token_ids, axis=0)            # (B, S, E)
    z = jax.nn.relu(emb @ p["w0"].T + p["b0"])                   # (B, S, E)
    x = jnp.transpose(z, (0, 2, 1))                              # (B, E, S)
    wih_t, whh_t = p["wih"].T, p["whh"].T
    bias = p["bih"] + p["bhh"]
    h = jnp.zeros((E, H), jnp.float32)
    c = jnp.zeros((E, H), jnp.float32)
    hs = []
    for t in range(B):
        gates = x[t] @ wih_t + h @ whh_t + bias                  # (E, 4H)
        i = jax.nn.sigmoid(gates[:, 0:H])
        f = jax.nn.sigmoid(gates[:, H:2 * H])
        g = jnp.tanh(gates[:, 2 * H:3 * H])
        o = jax.nn.sigmoid(gates[:, 3 * H:4 * H])
        c = f * c + i * g
        h = o * jnp.tanh(c)
        hs.append(h)
    h_all = jnp.stack(hs, axis=0)                                # (B, E, H)
    f1 = h_all @ p["w1"][0] + p["b1"][0]                         # (B, E)
    return f1 @ p["w2"][0] + p["b2"][0]                          # (B,)


if __name__ == "__main__":
    key = jax.random.PRNGKey(0)
    kp, kx = jax.random.split(key)

    B, S, E, vocab = 4, 8, 32, 50        # batch=4, input_len(seq)=8, emb_dim=32
    params = make_params(kp, vocab, E, S)
    token_ids = jax.random.randint(kx, (B, S), 0, vocab, dtype=jnp.int32)

    out = jax.block_until_ready(rnn_forward(token_ids, params))
    ref = jax.block_until_ready(rnn_reference(token_ids, params))

    assert out.shape == (B,)
    assert bool(jnp.all(jnp.isfinite(out)))
    assert bool(jnp.allclose(out, ref, atol=1e-4, rtol=1e-4))
    print("KERNEL_OK")
</pallas_src>

<mosaic_0001>
module attributes {stable_mosaic.version = 11 : i64} {
  func.func @rnn_kernel(%arg0: i32, %arg1: memref<32x32xf32, #tpu.memory_space<vmem>>, %arg2: memref<144x32xf32, #tpu.memory_space<vmem>>, %arg3: memref<1x4xf32, #tpu.memory_space<vmem>>, %arg4: memref<128x32xf32, #tpu.memory_space<vmem>>) attributes {dimension_semantics = [#tpu.dimension_semantics<arbitrary>], iteration_bounds = array<i64: 1>, scalar_prefetch = 0 : i64, scratch_operands = 1 : i64, tpu.core_type = #tpu.core_type<tc>, window_params = [{pipeline_mode = #tpu.pipeline_mode<synchronous>, transform_indices = @transform_0, window_bounds = array<i64: 32, 32>}, {pipeline_mode = #tpu.pipeline_mode<synchronous>, transform_indices = @transform_1, window_bounds = array<i64: 144, 32>}, {pipeline_mode = #tpu.pipeline_mode<synchronous>, transform_indices = @transform_2, window_bounds = array<i64: 1, 4>}]} {
    %c0 = arith.constant 0 : index
    %c0_0 = arith.constant 0 : index
    %0 = vector.load %arg2[%c0, %c0_0] : memref<144x32xf32, #tpu.memory_space<vmem>>, vector<32x32xf32>
    %c32 = arith.constant 32 : index
    %c0_1 = arith.constant 0 : index
    %1 = vector.load %arg2[%c32, %c0_1] : memref<144x32xf32, #tpu.memory_space<vmem>>, vector<1x32xf32>
    %c40 = arith.constant 40 : index
    %c0_2 = arith.constant 0 : index
    %2 = vector.load %arg2[%c40, %c0_2] : memref<144x32xf32, #tpu.memory_space<vmem>>, vector<32x8xf32>
    %c72 = arith.constant 72 : index
    %c0_3 = arith.constant 0 : index
    %3 = vector.load %arg2[%c72, %c0_3] : memref<144x32xf32, #tpu.memory_space<vmem>>, vector<32x8xf32>
    %c104 = arith.constant 104 : index
    %c0_4 = arith.constant 0 : index
    %4 = vector.load %arg2[%c104, %c0_4] : memref<144x32xf32, #tpu.memory_space<vmem>>, vector<32x1xf32>
    %c136 = arith.constant 136 : index
    %c0_5 = arith.constant 0 : index
    %5 = vector.load %arg2[%c136, %c0_5] : memref<144x32xf32, #tpu.memory_space<vmem>>, vector<8x32xf32>
    %c0_6 = arith.constant 0 : index
    %c0_7 = arith.constant 0 : index
    %6 = vector.load %arg1[%c0_6, %c0_7] : memref<32x32xf32, #tpu.memory_space<vmem>>, vector<32x32xf32>
    %cst = arith.constant dense<0.000000e+00> : vector<32x32xf32>
    %7 = tpu.matmul %6, %0, %cst {dimension_numbers = #tpu.dot_dimension_numbers<[1], [0], [0], [1], [0, 0, 1, 1], [], []>} : vector<32x32xf32>, vector<32x32xf32>, vector<32x32xf32> -> vector<32x32xf32>
    %8 = vector.broadcast %1 : vector<1x32xf32> to vector<32x32xf32>
    %9 = arith.addf %7, %8 : vector<32x32xf32>
    %cst_8 = arith.constant 0.000000e+00 : f32
    %10 = vector.broadcast %cst_8 : f32 to vector<32x32xf32>
    %11 = arith.maximumf %9, %10 : vector<32x32xf32>
    %12 = vector.extract_strided_slice %11 {offsets = [0, 0], sizes = [8, 32], strides = [1, 1]} : vector<32x32xf32> to vector<8x32xf32>
    %cst_9 = arith.constant dense<0.000000e+00> : vector<32x32xf32>
    %13 = tpu.matmul %2, %12, %cst_9 {dimension_numbers = #tpu.dot_dimension_numbers<[1], [0], [0], [1], [0, 0, 1, 1], [], []>} : vector<32x8xf32>, vector<8x32xf32>, vector<32x32xf32> -> vector<32x32xf32>
    %14 = vector.broadcast %4 : vector<32x1xf32> to vector<32x32xf32>
    %15 = arith.addf %13, %14 : vector<32x32xf32>
    %c0_10 = arith.constant 0 : index
    %c0_11 = arith.constant 0 : index
    %16 = vector.load %arg4[%c0_10, %c0_11] : memref<128x32xf32, #tpu.memory_space<vmem>>, vector<32x32xf32>
    tpu.vector_store %arg4[%c0_10, %c0_11], %15 {strides = array<i32>} : memref<128x32xf32, #tpu.memory_space<vmem>>, vector<32x32xf32>,
    %17 = vector.extract_strided_slice %11 {offsets = [8, 0], sizes = [8, 32], strides = [1, 1]} : vector<32x32xf32> to vector<8x32xf32>
    %cst_12 = arith.constant dense<0.000000e+00> : vector<32x32xf32>
    %18 = tpu.matmul %2, %17, %cst_12 {dimension_numbers = #tpu.dot_dimension_numbers<[1], [0], [0], [1], [0, 0, 1, 1], [], []>} : vector<32x8xf32>, vector<8x32xf32>, vector<32x32xf32> -> vector<32x32xf32>
    %19 = vector.broadcast %4 : vector<32x1xf32> to vector<32x32xf32>
    %20 = arith.addf %18, %19 : vector<32x32xf32>
    %c32_13 = arith.constant 32 : index
    %c0_14 = arith.constant 0 : index
    %21 = vector.load %arg4[%c32_13, %c0_14] : memref<128x32xf32, #tpu.memory_space<vmem>>, vector<32x32xf32>
    tpu.vector_store %arg4[%c32_13, %c0_14], %20 {strides = array<i32>} : memref<128x32xf32, #tpu.memory_space<vmem>>, vector<32x32xf32>,
    %22 = vector.extract_strided_slice %11 {offsets = [16, 0], sizes = [8, 32], strides = [1, 1]} : vector<32x32xf32> to vector<8x32xf32>
    %cst_15 = arith.constant dense<0.000000e+00> : vector<32x32xf32>
    %23 = tpu.matmul %2, %22, %cst_15 {dimension_numbers = #tpu.dot_dimension_numbers<[1], [0], [0], [1], [0, 0, 1, 1], [], []>} : vector<32x8xf32>, vector<8x32xf32>, vector<32x32xf32> -> vector<32x32xf32>
    %24 = vector.broadcast %4 : vector<32x1xf32> to vector<32x32xf32>
    %25 = arith.addf %23, %24 : vector<32x32xf32>
    %c64 = arith.constant 64 : index
    %c0_16 = arith.constant 0 : index
    %26 = vector.load %arg4[%c64, %c0_16] : memref<128x32xf32, #tpu.memory_space<vmem>>, vector<32x32xf32>
    tpu.vector_store %arg4[%c64, %c0_16], %25 {strides = array<i32>} : memref<128x32xf32, #tpu.memory_space<vmem>>, vector<32x32xf32>,
    %27 = vector.extract_strided_slice %11 {offsets = [24, 0], sizes = [8, 32], strides = [1, 1]} : vector<32x32xf32> to vector<8x32xf32>
    %cst_17 = arith.constant dense<0.000000e+00> : vector<32x32xf32>
    %28 = tpu.matmul %2, %27, %cst_17 {dimension_numbers = #tpu.dot_dimension_numbers<[1], [0], [0], [1], [0, 0, 1, 1], [], []>} : vector<32x8xf32>, vector<8x32xf32>, vector<32x32xf32> -> vector<32x32xf32>
    %29 = vector.broadcast %4 : vector<32x1xf32> to vector<32x32xf32>
    %30 = arith.addf %28, %29 : vector<32x32xf32>
    %c96 = arith.constant 96 : index
    %c0_18 = arith.constant 0 : index
    %31 = vector.load %arg4[%c96, %c0_18] : memref<128x32xf32, #tpu.memory_space<vmem>>, vector<32x32xf32>
    tpu.vector_store %arg4[%c96, %c0_18], %30 {strides = array<i32>} : memref<128x32xf32, #tpu.memory_space<vmem>>, vector<32x32xf32>,
    %32 = tpu.iota {dimensions = array<i32: 1>} : vector<1x4xi32>
    %cst_19 = arith.constant 0.000000e+00 : f32
    %33 = vector.broadcast %cst_19 : f32 to vector<8x32xf32>
    %cst_20 = arith.constant 0.000000e+00 : f32
    %34 = vector.broadcast %cst_20 : f32 to vector<8x32xf32>
    %cst_21 = arith.constant 0.000000e+00 : f32
    %35 = vector.broadcast %cst_21 : f32 to vector<1x4xf32>
    %c0_22 = arith.constant 0 : index
    %c0_23 = arith.constant 0 : index
    %36 = vector.load %arg4[%c0_22, %c0_23] : memref<128x32xf32, #tpu.memory_space<vmem>>, vector<32x32xf32>
    %cst_24 = arith.constant dense<0.000000e+00> : vector<32x32xf32>
    %37 = tpu.matmul %3, %33, %cst_24 {dimension_numbers = #tpu.dot_dimension_numbers<[1], [0], [0], [1], [0, 0, 1, 1], [], []>} : vector<32x8xf32>, vector<8x32xf32>, vector<32x32xf32> -> vector<32x32xf32>
    %38 = arith.addf %36, %37 : vector<32x32xf32>
    %39 = vector.extract_strided_slice %38 {offsets = [0, 0], sizes = [24, 32], strides = [1, 1]} : vector<32x32xf32> to vector<24x32xf32>
    %40 = arith.negf %39 : vector<24x32xf32>
    %41 = math.exp %40 : vector<24x32xf32>
    %cst_25 = arith.constant 1.000000e+00 : f32
    %42 = vector.broadcast %cst_25 : f32 to vector<24x32xf32>
    %43 = arith.addf %42, %41 : vector<24x32xf32>
    %44 = arith.divf %42, %43 : vector<24x32xf32>
    %45 = vector.extract_strided_slice %38 {offsets = [24, 0], sizes = [8, 32], strides = [1, 1]} : vector<32x32xf32> to vector<8x32xf32>
    %46 = math.tanh %45 : vector<8x32xf32>
    %47 = vector.extract_strided_slice %44 {offsets = [0, 0], sizes = [8, 32], strides = [1, 1]} : vector<24x32xf32> to vector<8x32xf32>
    %48 = vector.extract_strided_slice %44 {offsets = [8, 0], sizes = [8, 32], strides = [1, 1]} : vector<24x32xf32> to vector<8x32xf32>
    %49 = vector.extract_strided_slice %44 {offsets = [16, 0], sizes = [8, 32], strides = [1, 1]} : vector<24x32xf32> to vector<8x32xf32>
    %50 = arith.mulf %48, %34 : vector<8x32xf32>
    %51 = arith.mulf %47, %46 : vector<8x32xf32>
    %52 = arith.addf %50, %51 : vector<8x32xf32>
    %53 = math.tanh %52 : vector<8x32xf32>
    %54 = arith.mulf %49, %53 : vector<8x32xf32>
    %55 = arith.mulf %54, %5 : vector<8x32xf32>
    %cst_26 = arith.constant dense<0.000000e+00> : vector<32xf32>
    %56 = vector.multi_reduction <add>, %55, %cst_26 [0] : vector<8x32xf32> to vector<32xf32>
    %57 = vector.shape_cast %56 : vector<32xf32> to vector<1x32xf32>
    %cst_27 = arith.constant dense<0.000000e+00> : vector<1xf32>
    %58 = vector.multi_reduction <add>, %57, %cst_27 [1] : vector<1x32xf32> to vector<1xf32>
    %59 = vector.shape_cast %58 : vector<1xf32> to vector<1x1xf32>
    %c0_i32 = arith.constant 0 : i32
    %60 = vector.broadcast %c0_i32 : i32 to vector<1x4xi32>
    %61 = arith.cmpi eq, %32, %60 : vector<1x4xi32>
    %cst_28 = arith.constant 0.000000e+00 : f32
    %62 = vector.shape_cast %59 : vector<1x1xf32> to vector<1x1xf32>
    %63 = vector.broadcast %62 : vector<1x1xf32> to vector<1x4xf32>
    %64 = vector.broadcast %cst_28 : f32 to vector<1x4xf32>
    %65 = arith.select %61, %63, %64 : vector<1x4xi1>, vector<1x4xf32>
    %66 = arith.addf %35, %65 : vector<1x4xf32>
    %c32_29 = arith.constant 32 : index
    %c0_30 = arith.constant 0 : index
    %67 = vector.load %arg4[%c32_29, %c0_30] : memref<128x32xf32, #tpu.memory_space<vmem>>, vector<32x32xf32>
    %cst_31 = arith.constant dense<0.000000e+00> : vector<32x32xf32>
    %68 = tpu.matmul %3, %54, %cst_31 {dimension_numbers = #tpu.dot_dimension_numbers<[1], [0], [0], [1], [0, 0, 1, 1], [], []>} : vector<32x8xf32>, vector<8x32xf32>, vector<32x32xf32> -> vector<32x32xf32>
    %69 = arith.addf %67, %68 : vector<32x32xf32>
    %70 = vector.extract_strided_slice %69 {offsets = [0, 0], sizes = [24, 32], strides = [1, 1]} : vector<32x32xf32> to vector<24x32xf32>
    %71 = arith.negf %70 : vector<24x32xf32>
    %72 = math.exp %71 : vector<24x32xf32>
    %cst_32 = arith.constant 1.000000e+00 : f32
    %73 = vector.broadcast %cst_32 : f32 to vector<24x32xf32>
    %74 = arith.addf %73, %72 : vector<24x32xf32>
    %75 = arith.divf %73, %74 : vector<24x32xf32>
    %76 = vector.extract_strided_slice %69 {offsets = [24, 0], sizes = [8, 32], strides = [1, 1]} : vector<32x32xf32> to vector<8x32xf32>
    %77 = math.tanh %76 : vector<8x32xf32>
    %78 = vector.extract_strided_slice %75 {offsets = [0, 0], sizes = [8, 32], strides = [1, 1]} : vector<24x32xf32> to vector<8x32xf32>
    %79 = vector.extract_strided_slice %75 {offsets = [8, 0], sizes = [8, 32], strides = [1, 1]} : vector<24x32xf32> to vector<8x32xf32>
    %80 = vector.extract_strided_slice %75 {offsets = [16, 0], sizes = [8, 32], strides = [1, 1]} : vector<24x32xf32> to vector<8x32xf32>
    %81 = arith.mulf %79, %52 : vector<8x32xf32>
    %82 = arith.mulf %78, %77 : vector<8x32xf32>
    %83 = arith.addf %81, %82 : vector<8x32xf32>
    %84 = math.tanh %83 : vector<8x32xf32>
    %85 = arith.mulf %80, %84 : vector<8x32xf32>
    %86 = arith.mulf %85, %5 : vector<8x32xf32>
    %cst_33 = arith.constant dense<0.000000e+00> : vector<32xf32>
    %87 = vector.multi_reduction <add>, %86, %cst_33 [0] : vector<8x32xf32> to vector<32xf32>
    %88 = vector.shape_cast %87 : vector<32xf32> to vector<1x32xf32>
    %cst_34 = arith.constant dense<0.000000e+00> : vector<1xf32>
    %89 = vector.multi_reduction <add>, %88, %cst_34 [1] : vector<1x32xf32> to vector<1xf32>
    %90 = vector.shape_cast %89 : vector<1xf32> to vector<1x1xf32>
    %c1_i32 = arith.constant 1 : i32
    %91 = vector.broadcast %c1_i32 : i32 to vector<1x4xi32>
    %92 = arith.cmpi eq, %32, %91 : vector<1x4xi32>
    %cst_35 = arith.constant 0.000000e+00 : f32
    %93 = vector.shape_cast %90 : vector<1x1xf32> to vector<1x1xf32>
    %94 = vector.broadcast %93 : vector<1x1xf32> to vector<1x4xf32>
    %95 = vector.broadcast %cst_35 : f32 to vector<1x4xf32>
    %96 = arith.select %92, %94, %95 : vector<1x4xi1>, vector<1x4xf32>
    %97 = arith.addf %66, %96 : vector<1x4xf32>
    %c64_36 = arith.constant 64 : index
    %c0_37 = arith.constant 0 : index
    %98 = vector.load %arg4[%c64_36, %c0_37] : memref<128x32xf32, #tpu.memory_space<vmem>>, vector<32x32xf32>
    %cst_38 = arith.constant dense<0.000000e+00> : vector<32x32xf32>
    %99 = tpu.matmul %3, %85, %cst_38 {dimension_numbers = #tpu.dot_dimension_numbers<[1], [0], [0], [1], [0, 0, 1, 1], [], []>} : vector<32x8xf32>, vector<8x32xf32>, vector<32x32xf32> -> vector<32x32xf32>
    %100 = arith.addf %98, %99 : vector<32x32xf32>
    %101 = vector.extract_strided_slice %100 {offsets = [0, 0], sizes = [24, 32], strides = [1, 1]} : vector<32x32xf32> to vector<24x32xf32>
    %102 = arith.negf %101 : vector<24x32xf32>
    %103 = math.exp %102 : vector<24x32xf32>
    %cst_39 = arith.constant 1.000000e+00 : f32
    %104 = vector.broadcast %cst_39 : f32 to vector<24x32xf32>
    %105 = arith.addf %104, %103 : vector<24x32xf32>
    %106 = arith.divf %104, %105 : vector<24x32xf32>
    %107 = vector.extract_strided_slice %100 {offsets = [24, 0], sizes = [8, 32], strides = [1, 1]} : vector<32x32xf32> to vector<8x32xf32>
    %108 = math.tanh %107 : vector<8x32xf32>
    %109 = vector.extract_strided_slice %106 {offsets = [0, 0], sizes = [8, 32], strides = [1, 1]} : vector<24x32xf32> to vector<8x32xf32>
    %110 = vector.extract_strided_slice %106 {offsets = [8, 0], sizes = [8, 32], strides = [1, 1]} : vector<24x32xf32> to vector<8x32xf32>
    %111 = vector.extract_strided_slice %106 {offsets = [16, 0], sizes = [8, 32], strides = [1, 1]} : vector<24x32xf32> to vector<8x32xf32>
    %112 = arith.mulf %110, %83 : vector<8x32xf32>
    %113 = arith.mulf %109, %108 : vector<8x32xf32>
    %114 = arith.addf %112, %113 : vector<8x32xf32>
    %115 = math.tanh %114 : vector<8x32xf32>
    %116 = arith.mulf %111, %115 : vector<8x32xf32>
    %117 = arith.mulf %116, %5 : vector<8x32xf32>
    %cst_40 = arith.constant dense<0.000000e+00> : vector<32xf32>
    %118 = vector.multi_reduction <add>, %117, %cst_40 [0] : vector<8x32xf32> to vector<32xf32>
    %119 = vector.shape_cast %118 : vector<32xf32> to vector<1x32xf32>
    %cst_41 = arith.constant dense<0.000000e+00> : vector<1xf32>
    %120 = vector.multi_reduction <add>, %119, %cst_41 [1] : vector<1x32xf32> to vector<1xf32>
    %121 = vector.shape_cast %120 : vector<1xf32> to vector<1x1xf32>
    %c2_i32 = arith.constant 2 : i32
    %122 = vector.broadcast %c2_i32 : i32 to vector<1x4xi32>
    %123 = arith.cmpi eq, %32, %122 : vector<1x4xi32>
    %cst_42 = arith.constant 0.000000e+00 : f32
    %124 = vector.shape_cast %121 : vector<1x1xf32> to vector<1x1xf32>
    %125 = vector.broadcast %124 : vector<1x1xf32> to vector<1x4xf32>
    %126 = vector.broadcast %cst_42 : f32 to vector<1x4xf32>
    %127 = arith.select %123, %125, %126 : vector<1x4xi1>, vector<1x4xf32>
    %128 = arith.addf %97, %127 : vector<1x4xf32>
    %c96_43 = arith.constant 96 : index
    %c0_44 = arith.constant 0 : index
    %129 = vector.load %arg4[%c96_43, %c0_44] : memref<128x32xf32, #tpu.memory_space<vmem>>, vector<32x32xf32>
    %cst_45 = arith.constant dense<0.000000e+00> : vector<32x32xf32>
    %130 = tpu.matmul %3, %116, %cst_45 {dimension_numbers = #tpu.dot_dimension_numbers<[1], [0], [0], [1], [0, 0, 1, 1], [], []>} : vector<32x8xf32>, vector<8x32xf32>, vector<32x32xf32> -> vector<32x32xf32>
    %131 = arith.addf %129, %130 : vector<32x32xf32>
    %132 = vector.extract_strided_slice %131 {offsets = [0, 0], sizes = [24, 32], strides = [1, 1]} : vector<32x32xf32> to vector<24x32xf32>
    %133 = arith.negf %132 : vector<24x32xf32>
    %134 = math.exp %133 : vector<24x32xf32>
    %cst_46 = arith.constant 1.000000e+00 : f32
    %135 = vector.broadcast %cst_46 : f32 to vector<24x32xf32>
    %136 = arith.addf %135, %134 : vector<24x32xf32>
    %137 = arith.divf %135, %136 : vector<24x32xf32>
    %138 = vector.extract_strided_slice %131 {offsets = [24, 0], sizes = [8, 32], strides = [1, 1]} : vector<32x32xf32> to vector<8x32xf32>
    %139 = math.tanh %138 : vector<8x32xf32>
    %140 = vector.extract_strided_slice %137 {offsets = [0, 0], sizes = [8, 32], strides = [1, 1]} : vector<24x32xf32> to vector<8x32xf32>
    %141 = vector.extract_strided_slice %137 {offsets = [8, 0], sizes = [8, 32], strides = [1, 1]} : vector<24x32xf32> to vector<8x32xf32>
    %142 = vector.extract_strided_slice %137 {offsets = [16, 0], sizes = [8, 32], strides = [1, 1]} : vector<24x32xf32> to vector<8x32xf32>
    %143 = arith.mulf %141, %114 : vector<8x32xf32>
    %144 = arith.mulf %140, %139 : vector<8x32xf32>
    %145 = arith.addf %143, %144 : vector<8x32xf32>
    %146 = math.tanh %145 : vector<8x32xf32>
    %147 = arith.mulf %142, %146 : vector<8x32xf32>
    %148 = arith.mulf %147, %5 : vector<8x32xf32>
    %cst_47 = arith.constant dense<0.000000e+00> : vector<32xf32>
    %149 = vector.multi_reduction <add>, %148, %cst_47 [0] : vector<8x32xf32> to vector<32xf32>
    %150 = vector.shape_cast %149 : vector<32xf32> to vector<1x32xf32>
    %cst_48 = arith.constant dense<0.000000e+00> : vector<1xf32>
    %151 = vector.multi_reduction <add>, %150, %cst_48 [1] : vector<1x32xf32> to vector<1xf32>
    %152 = vector.shape_cast %151 : vector<1xf32> to vector<1x1xf32>
    %c3_i32 = arith.constant 3 : i32
    %153 = vector.broadcast %c3_i32 : i32 to vector<1x4xi32>
    %154 = arith.cmpi eq, %32, %153 : vector<1x4xi32>
    %cst_49 = arith.constant 0.000000e+00 : f32
    %155 = vector.shape_cast %152 : vector<1x1xf32> to vector<1x1xf32>
    %156 = vector.broadcast %155 : vector<1x1xf32> to vector<1x4xf32>
    %157 = vector.broadcast %cst_49 : f32 to vector<1x4xf32>
    %158 = arith.select %154, %156, %157 : vector<1x4xi1>, vector<1x4xf32>
    %159 = arith.addf %128, %158 : vector<1x4xf32>
    %c0_50 = arith.constant 0 : index
    %c0_51 = arith.constant 0 : index
    %160 = vector.load %arg3[%c0_50, %c0_51] : memref<1x4xf32, #tpu.memory_space<vmem>>, vector<1x4xf32>
    tpu.vector_store %arg3[%c0_50, %c0_51], %159 {strides = array<i32>} : memref<1x4xf32, #tpu.memory_space<vmem>>, vector<1x4xf32>,
    return
  }
  func.func @transform_0(%arg0: i32) -> (i32, i32) {
    %c0_i32 = arith.constant 0 : i32
    %c0_i32_0 = arith.constant 0 : i32
    %c0_i32_1 = arith.constant 0 : i32
    return %c0_i32, %c0_i32_0 : i32, i32
  }
  func.func @transform_1(%arg0: i32) -> (i32, i32) {
    %c0_i32 = arith.constant 0 : i32
    %c0_i32_0 = arith.constant 0 : i32
    %c0_i32_1 = arith.constant 0 : i32
    return %c0_i32, %c0_i32_0 : i32, i32
  }
  func.func @transform_2(%arg0: i32) -> (i32, i32) {
    %c0_i32 = arith.constant 0 : i32
    %c0_i32_0 = arith.constant 0 : i32
    %c0_i32_1 = arith.constant 0 : i32
    return %c0_i32, %c0_i32_0 : i32, i32
  }
}

</mosaic_0001>

<bundles_post_ra>
// kernel: tpu_custom_call.1
= control target key start
LH: loop header
LB: loop body
LE: loop exit
PB: predicated region body
PF: predicated region fallthrough
CT: control target
= control target key end

     0   :  { %vm38_vm0 = vcmask 261120   ;;  %s1545_s0 = inlined_call_operand.vmem [shape: f32[32,32], index: 0, kind: input, shape index: {}]   ;;  %s1546_s1 = inlined_call_operand.vmem [shape: f32[144,32], index: 1, kind: input, shape index: {}]   ;;  %s1547_s2 = inlined_call_operand.hbm [shape: f32[1,4], index: 2, kind: output, shape index: {}]  }
   0x1   :  { %v12_v0 = vld [vmem:[%s1546_s1] sm:$0xff]  ;;  %v13_v1 = vld [vmem:[%s1546_s1 + $0x8] sm:$0xff]  ;;  %v14_v2 = vld [vmem:[%s1546_s1 + $0x10] sm:$0xff] }
   0x2   :  { %v1258_v3 = vpack.c.bf16 %v13_v1, %v12_v0  ;;  %v15_v4 = vld [vmem:[%s1546_s1 + $0x18] sm:$0xff]  ;;  %v30_v5 = vld [vmem:[%s1545_s0] sm:$0xff] }
   0x3   :  { %v1262_v6 = vpack.c.bf16 %v15_v4, %v14_v2  ;;  %1188 = vmatprep.mubr.msk.f32.mxu0 %vm38_vm0, %v30_v5 }
   0x4   :  { %7 = vsyncpa [#allocation4], 0  ;;  %1259 = vmatprep.subr.bf16.mxu0 %v1258_v3  ;;  %v31_v7 = vld [vmem:[%s1545_s0 + $0x8] sm:$0xff]  ;;  %v32_v8 = vld [vmem:[%s1545_s0 + $0x10] sm:$0xff]  ;;  %vm160_vm1 = vcmask 64512   ;;  %v1359_v12 = vmov 0  }
   0x5   :  { %1261 = vmatpush3.bf16.msra.mxu0 %v1258_v3  ;;  %v33_v9 = vld [vmem:[%s1545_s0 + $0x18] sm:$0xff]  ;;  %v17_v10 = vld [vmem:[%s1546_s1 + $0x28] sm:$0xff]  ;;  %1269 = vset.pattern.permute.xlu0 %v1359_v12  ;;  %v26_v14 = vld [vmem:[%s1546_s1 + $0x70] sm:$0xff]  ;;  %v1360_v32 = vmov 0.0   ;;  %vm1067_vm6 = vcmask 24576  }
   0x6   :  { %1263 = vmatprep.subr.bf16.mxu0 %v1262_v6  ;;  %1196 = vmatprep.mubr.msk.f32.mxu1 %vm160_vm1, %v17_v10  ;;  %v25_v11 = vld [vmem:[%s1546_s1 + $0x68] sm:$0xff]  ;;  %v27_v13 = vld [vmem:[%s1546_s1 + $0x78] sm:$0xff]  ;;  %v28_v15 = vld [vmem:[%s1546_s1 + $0x80] sm:$0xff] }
   0x7   :  { %1270 = vset.pattern.permute.xlu1 %v1359_v12  ;;  %142 = vperm.xlu0 %1269, %v25_v11   ;;  %v1083_v16 = vld [vmem:[%s1546_s1 + $0x20] ss:$0 sm:$0xff]  ;;  %v18_v25 = vld [vmem:[%s1546_s1 + $0x30] sm:$0xff]  ;;  %v19_v28 = vld [vmem:[%s1546_s1 + $0x38] sm:$0xff] }
   0x8   :  { %152 = vperm.xlu1 %1270, %v27_v13   ;;  %v20_v31 = vld [vmem:[%s1546_s1 + $0x40] sm:$0xff]  ;;  %v1443_v33 = vld [vmem:[%s1546_s1 + $0x48] sm:$0xff]  ;;  %v1451_v34 = vld [vmem:[%s1546_s1 + $0x50] sm:$0xff] }
   0x9   :  { %1265 = vmatpush3.bf16.msra.mxu0 %v1262_v6  ;;  %v1458_v35 = vld [vmem:[%s1546_s1 + $0x58] sm:$0xff]  ;;  %v1469_v36 = vld [vmem:[%s1546_s1 + $0x60] sm:$0xff] }
   0xb   :  { %147 = vperm.xlu0 %1269, %v26_v14  }
   0xc   :  { %1189 = vmatmul.mubr.msk.f32.vlgmr.msra.gmra.mrb[0].mxu0 %vm38_vm0, %v31_v7  ;;  %157 = vperm.xlu1 %1270, %v28_v15  }
   0xd   :  { %1191 = vmatprep.mubr.msk.f32.mxu0 %vm38_vm0, %v32_v8 }
  0x10   :  { %1192 = vmatmul.mubr.msk.f32.gmra.mrb[2].mxu0 %vm38_vm0, %v33_v9 }
  0x11   :  { %1212 = vmatprep.mubr.msk.f32.mxu0 %vm160_vm1, %v17_v10 }
  0x86   :  { %v143_v37 = vpop.permute.xlu0 %142 }
  0x87   :  { %v153_v38 = vpop.permute.xlu1 %152 }
  0x8a   :  { %v148_v39 = vpop.permute.xlu0 %147 }
  0x8b   :  { %v158_v44 = vpop.permute.xlu1 %157 }
  0xdf   :  { %v1190_v17 = vpop.f32.mrb[0].mxu0 }
  0xe0   :  { %v117_v18 = vpop.f32.mrb[1].mxu0  ;;  %v123_v19 = vadd.f32 %v1190_v17, %v1083_v16 }
  0xe1   :  { %v118_v20 = vadd.f32 %v1083_v16, %v117_v18 }
  0xe2   :  { %v137_v26 = vmax.f32 %v123_v19, 0.0 }
  0xe3   :  { %v136_v21 = vmax.f32 %v118_v20, 0.0  ;;  %v1193_v22 = vpop.f32.mrb[2].mxu0 }
  0xe4   :  { %v133_v23 = vadd.f32 %v1193_v22, %v1083_v16  ;;  %v127_v24 = vpop.f32.mrb[3].mxu0 }
  0xe5   :  { %v128_v27 = vadd.f32 %v1083_v16, %v127_v24  ;;  %1194 = vmatprep.subr.mxu1 %v136_v21 }
  0xe6   :  { %v139_v29 = vmax.f32 %v133_v23, 0.0  ;;  %1195 = vmatpush3.msra.mxu1 %v136_v21 }
  0xe7   :  { %v138_v30 = vmax.f32 %v128_v27, 0.0  ;;  %1197 = vmatmul.mubr.msk.f32.vlgmr.msra.gmra.mrb[0].mxu1 %vm160_vm1, %v18_v25  ;;  %1202 = vmatprep.subr.mxu1 %v137_v26 }
  0xe8   :  { %1203 = vmatpush3.msra.mxu1 %v137_v26  ;;  %1199 = vmatprep.mubr.msk.f32.mxu1 %vm160_vm1, %v19_v28 }
  0xe9   :  { %1210 = vmatprep.subr.mxu0 %v138_v30  ;;  %1218 = vmatprep.subr.mxu1 %v139_v29 }
  0xea   :  { %1211 = vmatpush3.msra.mxu0 %v138_v30 }
  0xeb   :  { %1200 = vmatmul.mubr.msk.f32.gmra.mrb[2].mxu1 %vm160_vm1, %v20_v31  ;;  %1213 = vmatmul.mubr.msk.f32.vlgmr.msra.gmra.mrb[4].mxu0 %vm160_vm1, %v18_v25 }
  0xec   :  { %1204 = vmatprep.mubr.msk.f32.mxu1 %vm160_vm1, %v17_v10  ;;  %1215 = vmatprep.mubr.msk.f32.mxu0 %vm160_vm1, %v19_v28 }
  0xed   :  { %1226 = vmatprep.subr.mxu0 %v1360_v32 }
  0xee   :  { %1227 = vmatpush3.msra.mxu0 %v1360_v32 }
  0xef   :  { %1205 = vmatmul.mubr.msk.f32.vlgmr.msra.gmra.mrb[4].mxu1 %vm160_vm1, %v18_v25  ;;  %1216 = vmatmul.mubr.msk.f32.gmra.mrb[6].mxu0 %vm160_vm1, %v20_v31 }
  0xf0   :  { %1219 = vmatpush3.msra.mxu1 %v139_v29  ;;  %1207 = vmatprep.mubr.msk.f32.mxu1 %vm160_vm1, %v19_v28 }
  0xf1   :  { %1228 = vmatprep.mubr.msk.f32.mxu0 %vm160_vm1, %v1443_v33 }
  0xf3   :  { %1208 = vmatmul.mubr.msk.f32.gmra.mrb[6].mxu1 %vm160_vm1, %v20_v31  ;;  %1229 = vmatmul.mubr.msk.f32.vlgmr.msra.gmra.mrb[8].mxu0 %vm160_vm1, %v1451_v34 }
  0xf4   :  { %1220 = vmatprep.mubr.msk.f32.mxu1 %vm160_vm1, %v17_v10  ;;  %1231 = vmatprep.mubr.msk.f32.mxu0 %vm160_vm1, %v1458_v35 }
  0xf7   :  { %1221 = vmatmul.mubr.msk.f32.vlgmr.msra.gmra.mrb[8].mxu1 %vm160_vm1, %v18_v25  ;;  %1232 = vmatmul.mubr.msk.f32.gmra.mrb[10].mxu0 %vm160_vm1, %v1469_v36 }
  0xf8   :  { %1223 = vmatprep.mubr.msk.f32.mxu1 %vm160_vm1, %v19_v28  ;;  %1244 = vmatprep.mubr.msk.f32.mxu0 %vm160_vm1, %v1443_v33 }
  0xfb   :  { %1224 = vmatmul.mubr.msk.f32.gmra.mrb[10].mxu1 %vm160_vm1, %v20_v31 }
  0xfc   :  { %1236 = vmatprep.mubr.msk.f32.mxu1 %vm160_vm1, %v1443_v33 }
 0x1ba   :  { %v1198_v40 = vpop.f32.mrb[0].mxu1 }
 0x1bb   :  { %v245_v41 = vadd.f32 %v1198_v40, %v148_v39  ;;  %v239_v42 = vpop.f32.mrb[1].mxu1 }
 0x1bc   :  { %v240_v43 = vadd.f32 %v239_v42, %v143_v37  ;;  %v1499_v42 = vld [vmem:[%s1546_s1 + $0x88] sm:$0xff]  ;;  %s1361_s1 = smov [#allocation3]  }
 0x1bd   :  { %259 = vst.msk [vmem:[#allocation2 + $0x8] sm:$0xff] %vm38_vm0, %v245_v41  ;;  %s1075_s24 = sshll.u32 %s1361_s1, 4  ;;  %s1076_s24 = int_to_ptr.vmem [resolvable:$true] %s1075_s24 }
 0x1be   :  { %258 = vst.msk [vmem:[#allocation2] sm:$0xff] %vm38_vm0, %v240_v43  ;;  %v1214_v45 = vpop.f32.mrb[4].mxu0  ;;  %v1201_v46 = vpop.f32.mrb[2].mxu1  ;;  %s1335_s25 = scalar_lea.vmem %s1076_s24, 16  ;;  %s1339_s26 = scalar_lea.vmem %s1076_s24, 32 }
 0x1bf   :  { %v423_v47 = vadd.f32 %v1214_v45, %v148_v39  ;;  %v417_v48 = vpop.f32.mrb[5].mxu0  ;;  %v249_v49 = vpop.f32.mrb[3].mxu1  ;;  %v255_v50 = vadd.f32 %v1201_v46, %v158_v44  ;;  %p1336_p0 = scmp.ne.s32.totalorder %s1076_s24, %s1335_s25  ;;  %p1340_p1 = scmp.lt.s32.totalorder %s1076_s24, %s1076_s24 }
 0x1c0   :  { %v418_v51 = vadd.f32 %v417_v48, %v143_v37  ;;  %v250_v52 = vadd.f32 %v249_v49, %v153_v38  ;;  %p1341_p2 = scmp.lt.s32.totalorder %s1339_s26, %s1335_s25 }
 0x1c1   :  { %437 = vst.msk [vmem:[#allocation2 + $0x48] sm:$0xff] %vm38_vm0, %v423_v47  ;;  %261 = vst.msk [vmem:[#allocation2 + $0x18] sm:$0xff] %vm38_vm0, %v255_v50 }
 0x1c2   :  { %436 = vst.msk [vmem:[#allocation2 + $0x40] sm:$0xff] %vm38_vm0, %v418_v51  ;;  %260 = vst.msk [vmem:[#allocation2 + $0x10] sm:$0xff] %vm38_vm0, %v250_v52  ;;  %v1206_v53 = vpop.f32.mrb[4].mxu1  ;;  %v1217_v54 = vpop.f32.mrb[6].mxu0  ;;  %p1342_p3 = por %p1341_p2, %p1340_p1 }
 0x1c3   :  { %v334_v55 = vadd.f32 %v1206_v53, %v148_v39  ;;  %v433_v56 = vadd.f32 %v1217_v54, %v158_v44  ;;  %v328_v57 = vpop.f32.mrb[5].mxu1  ;;  %v427_v58 = vpop.f32.mrb[7].mxu0 }
 0x1c4   :  { %v329_v59 = vadd.f32 %v328_v57, %v143_v37  ;;  %v428_v60 = vadd.f32 %v427_v58, %v153_v38  ;;  %v532_v61 = vld [vmem:[#allocation2 + $0x8] sm:$0xff]  ;;  %p1343_p4 = pnand %p1342_p3, %p1336_p0 }
 0x1c5   :  { %348 = vst.msk [vmem:[#allocation2 + $0x28] sm:$0xff] %vm38_vm0, %v334_v55  ;;  %439 = vst.msk [vmem:[#allocation2 + $0x58] sm:$0xff] %vm38_vm0, %v433_v56  ;;  %v531_v2 = vld [vmem:[#allocation2] sm:$0xff] }
 0x1c6   :  { %347 = vst.msk [vmem:[#allocation2 + $0x20] sm:$0xff] %vm38_vm0, %v329_v59  ;;  %438 = vst.msk [vmem:[#allocation2 + $0x50] sm:$0xff] %vm38_vm0, %v428_v60  ;;  %v1230_v62 = vpop.f32.mrb[8].mxu0  ;;  %v1209_v63 = vpop.f32.mrb[6].mxu1 }
 0x1c7   :  { %v633_v0 = vadd.f32 %v1230_v62, %v532_v61  ;;  %v344_v1 = vadd.f32 %v1209_v63, %v158_v44  ;;  %v613_v3 = vpop.f32.mrb[9].mxu0  ;;  %v338_v4 = vpop.f32.mrb[7].mxu1 }
 0x1c8   :  { %v632_v5 = vadd.f32 %v613_v3, %v531_v2  ;;  %v339_v6 = vadd.f32 %v338_v4, %v153_v38  ;;  %v534_v21 = vld [vmem:[#allocation2 + $0x18] sm:$0xff] }
 0x1c9   :  { %v1109_v7 = vmul.f32 -1.442695, %v633_v0  ;;  %350 = vst.msk [vmem:[#allocation2 + $0x38] sm:$0xff] %vm38_vm0, %v344_v1  ;;  %v533_v13 = vld [vmem:[#allocation2 + $0x10] sm:$0xff] }
 0x1ca   :  { %v1108_v8 = vmul.f32 -1.442695, %v632_v5  ;;  %349 = vst.msk [vmem:[#allocation2 + $0x30] sm:$0xff] %vm38_vm0, %v339_v6  ;;  %v1222_v9 = vpop.f32.mrb[8].mxu1  ;;  %v1233_v10 = vpop.f32.mrb[10].mxu0 }
 0x1cb   :  { %1271 = vpow2.f32 %v1109_v7  ;;  %v512_v11 = vadd.f32 %v1222_v9, %v148_v39  ;;  %v506_v12 = vpop.f32.mrb[9].mxu1  ;;  %v623_v14 = vpop.f32.mrb[11].mxu0  ;;  %v635_v23 = vadd.f32 %v1233_v10, %v534_v21 }
 0x1cc   :  { %1273 = vpow2.f32 %v1108_v8  ;;  %v507_v15 = vadd.f32 %v506_v12, %v143_v37  ;;  %v634_v17 = vadd.f32 %v623_v14, %v533_v13  ;;  %v675_v53 = vld [vmem:[#allocation2 + $0x28] sm:$0xff] }
 0x1cd   :  { %526 = vst.msk [vmem:[#allocation2 + $0x68] sm:$0xff] %vm38_vm0, %v512_v11  ;;  %v674_v56 = vld [vmem:[#allocation2 + $0x20] sm:$0xff] }
 0x1ce   :  { %525 = vst.msk [vmem:[#allocation2 + $0x60] sm:$0xff] %vm38_vm0, %v507_v15  ;;  %v1225_v16 = vpop.f32.mrb[10].mxu1  ;;  %v1110_v22 = vmul.f32 -1.442695, %v634_v17 }
 0x1cf   :  { %v522_v18 = vadd.f32 %v1225_v16, %v158_v44  ;;  %v516_v19 = vpop.f32.mrb[11].mxu1 }
 0x1d0   :  { %v517_v20 = vadd.f32 %v516_v19, %v153_v38  ;;  %1275 = vpow2.f32 %v1110_v22  ;;  %v677_v0 = vld [vmem:[#allocation2 + $0x38] sm:$0xff] }
 0x1d1   :  { %528 = vst.msk [vmem:[#allocation2 + $0x78] sm:$0xff] %vm38_vm0, %v522_v18  ;;  %1277 = vtanh.f32 %v635_v23  ;;  %v676_v63 = vld [vmem:[#allocation2 + $0x30] sm:$0xff] }
 0x1d2   :  { %527 = vst.msk [vmem:[#allocation2 + $0x70] sm:$0xff] %vm38_vm0, %v517_v20 }
 0x1d5   :  { %v1272_v24 = vpop.eup %1271 }
 0x1d6   :  { %v1274_v25 = vpop.eup %1273  ;;  %v646_v26 = vadd.f32 1.0, %v1272_v24 }
 0x1d7   :  { %v645_v27 = vadd.f32 1.0, %v1274_v25 }
 0x1d8   :  { %1279 = vrcp.f32 %v646_v26 }
 0x1d9   :  { %1281 = vrcp.f32 %v645_v27  ;;  %v806_v27 = vld [vmem:[#allocation2 + $0x48] sm:$0xff] }
 0x1da   :  { %v1276_v28 = vpop.eup %1275 }
 0x1db   :  { %v1278_v29 = vpop.eup %1277  ;;  %v647_v37 = vadd.f32 1.0, %v1276_v28 }
 0x1dd   :  { %1283 = vrcp.f32 %v647_v37 }
 0x1e2   :  { %v1280_v30 = vpop.eup %1279 }
 0x1e3   :  { %v1282_v31 = vpop.eup %1281  ;;  %v655_v32 = vmul.f32 0.0, %v1280_v30  ;;  %v805_v30 = vld [vmem:[#allocation2 + $0x40] sm:$0xff] }
 0x1e4   :  { %v656_v38 = vmul.f32 %v1282_v31, %v1278_v29 }
 0x1e6   :  { %v657_v39 = vadd.f32 %v656_v38, %v655_v32 }
 0x1e7   :  { %v1284_v40 = vpop.eup %1283 }
 0x1e8   :  { %1285 = vtanh.f32 %v657_v39 }
 0x1f2   :  { %v1286_v41 = vpop.eup %1285 }
 0x1f3   :  { %v659_v43 = vmul.f32 %v1286_v41, %v1284_v40  ;;  %v807_v41 = vld [vmem:[#allocation2 + $0x50] sm:$0xff] }
 0x1f5   :  { %v660_v44 = vmul.f32 %v659_v43, %v1499_v42  ;;  %1234 = vmatprep.subr.mxu1 %v659_v43 }
 0x1f6   :  { %1235 = vmatpush3.msra.mxu1 %v659_v43 }
 0x1f7   :  { %1237 = vmatmul.mubr.msk.f32.vlgmr.msra.gmra.mrb[12].mxu1 %vm160_vm1, %v1451_v34  ;;  %v661_v45 = vsel %vm38_vm0, %v660_v44, 0.0  ;;  %v808_v44 = vld [vmem:[#allocation2 + $0x58] sm:$0xff] }
 0x1f8   :  { %1239 = vmatprep.mubr.msk.f32.mxu1 %vm160_vm1, %v1458_v35  ;;  %v662_v46 = vrot.slane %v661_v45, 4 }
 0x1fa   :  { %v663_v47 = vadd.f32 %v662_v46, %v661_v45 }
 0x1fb   :  { %1240 = vmatmul.mubr.msk.f32.gmra.mrb[14].mxu1 %vm160_vm1, %v1469_v36 }
 0x1fc   :  { %v664_v48 = vrot.slane %v663_v47, 2  ;;  %1252 = vmatprep.mubr.msk.f32.mxu1 %vm160_vm1, %v1443_v33 }
 0x1fe   :  { %v665_v49 = vadd.f32 %v664_v48, %v663_v47 }
 0x200   :  { %v666_v50 = vrot.slane %v665_v49, 1 }
 0x202   :  { %v667_v51 = vadd.f32 %v666_v50, %v665_v49 }
 0x204   :  { %v668_v52 = vsel %vm38_vm0, %v667_v51, 0.0 }
 0x205   :  { %669 = vadd.xlane.f32.xlu0 %v668_v52 }
 0x2ca   :  { %v1238_v54 = vpop.f32.mrb[12].mxu1 }
 0x2cb   :  { %v764_v55 = vadd.f32 %v1238_v54, %v675_v53  ;;  %v744_v57 = vpop.f32.mrb[13].mxu1 }
 0x2cc   :  { %v763_v58 = vadd.f32 %v744_v57, %v674_v56 }
 0x2cd   :  { %v1116_v59 = vmul.f32 -1.442695, %v764_v55 }
 0x2ce   :  { %v1115_v60 = vmul.f32 -1.442695, %v763_v58  ;;  %v1241_v61 = vpop.f32.mrb[14].mxu1 }
 0x2cf   :  { %1287 = vpow2.f32 %v1116_v59  ;;  %v754_v62 = vpop.f32.mrb[15].mxu1  ;;  %v766_v2 = vadd.f32 %v1241_v61, %v677_v0 }
 0x2d0   :  { %1289 = vpow2.f32 %v1115_v60  ;;  %v765_v33 = vadd.f32 %v754_v62, %v676_v63 }
 0x2d2   :  { %v1117_v1 = vmul.f32 -1.442695, %v765_v33 }
 0x2d4   :  { %1291 = vpow2.f32 %v1117_v1 }
 0x2d5   :  { %1293 = vtanh.f32 %v766_v2 }
 0x2d9   :  { %v1288_v3 = vpop.eup %1287 }
 0x2da   :  { %v1290_v4 = vpop.eup %1289  ;;  %v777_v5 = vadd.f32 1.0, %v1288_v3 }
 0x2db   :  { %v776_v6 = vadd.f32 1.0, %v1290_v4 }
 0x2dc   :  { %1295 = vrcp.f32 %v777_v5 }
 0x2dd   :  { %1297 = vrcp.f32 %v776_v6  ;;  %v937_v6 = vld [vmem:[#allocation2 + $0x68] sm:$0xff] }
 0x2de   :  { %v1292_v7 = vpop.eup %1291 }
 0x2df   :  { %v1294_v8 = vpop.eup %1293  ;;  %v778_v12 = vadd.f32 1.0, %v1292_v7 }
 0x2e1   :  { %1299 = vrcp.f32 %v778_v12 }
 0x2e6   :  { %v1296_v9 = vpop.eup %1295 }
 0x2e7   :  { %v1298_v10 = vpop.eup %1297  ;;  %v786_v11 = vmul.f32 %v1296_v9, %v657_v39 }
 0x2e8   :  { %v787_v13 = vmul.f32 %v1298_v10, %v1294_v8  ;;  %v936_v8 = vld [vmem:[#allocation2 + $0x60] sm:$0xff] }
 0x2ea   :  { %v788_v14 = vadd.f32 %v787_v13, %v786_v11 }
 0x2eb   :  { %v1300_v15 = vpop.eup %1299 }
 0x2ec   :  { %1301 = vtanh.f32 %v788_v14 }
 0x2f6   :  { %v1302_v16 = vpop.eup %1301 }
 0x2f7   :  { %v790_v17 = vmul.f32 %v1302_v16, %v1300_v15  ;;  %v939_v15 = vld [vmem:[#allocation2 + $0x78] sm:$0xff] }
 0x2f9   :  { %v791_v18 = vmul.f32 %v790_v17, %v1499_v42  ;;  %1242 = vmatprep.subr.mxu0 %v790_v17 }
 0x2fa   :  { %1243 = vmatpush3.msra.mxu0 %v790_v17 }
 0x2fb   :  { %1245 = vmatmul.mubr.msk.f32.vlgmr.msra.gmra.mrb[12].mxu0 %vm160_vm1, %v1451_v34  ;;  %v792_v19 = vsel %vm38_vm0, %v791_v18, 0.0 }
 0x2fc   :  { %1247 = vmatprep.mubr.msk.f32.mxu0 %vm160_vm1, %v1458_v35  ;;  %v793_v20 = vrot.slane %v792_v19, 4 }
 0x2fe   :  { %v794_v21 = vadd.f32 %v793_v20, %v792_v19 }
 0x2ff   :  { %1248 = vmatmul.mubr.msk.f32.gmra.mrb[14].mxu0 %vm160_vm1, %v1469_v36 }
 0x300   :  { %v795_v22 = vrot.slane %v794_v21, 2 }
 0x302   :  { %v796_v23 = vadd.f32 %v795_v22, %v794_v21 }
 0x304   :  { %v797_v24 = vrot.slane %v796_v23, 1 }
 0x306   :  { %v798_v25 = vadd.f32 %v797_v24, %v796_v23 }
 0x308   :  { %v799_v26 = vsel %vm38_vm0, %v798_v25, 0.0 }
 0x309   :  { %800 = vadd.xlane.f32.xlu1 %v799_v26 }
 0x3ce   :  { %v1246_v28 = vpop.f32.mrb[12].mxu0 }
 0x3cf   :  { %v895_v29 = vadd.f32 %v1246_v28, %v806_v27  ;;  %v875_v31 = vpop.f32.mrb[13].mxu0 }
 0x3d0   :  { %v894_v32 = vadd.f32 %v875_v31, %v805_v30 }
 0x3d1   :  { %v1123_v37 = vmul.f32 -1.442695, %v895_v29 }
 0x3d2   :  { %v1122_v38 = vmul.f32 -1.442695, %v894_v32  ;;  %v1249_v39 = vpop.f32.mrb[14].mxu0 }
 0x3d3   :  { %1303 = vpow2.f32 %v1123_v37  ;;  %v885_v40 = vpop.f32.mrb[15].mxu0  ;;  %v897_v46 = vadd.f32 %v1249_v39, %v808_v44 }
 0x3d4   :  { %1305 = vpow2.f32 %v1122_v38  ;;  %v896_v43 = vadd.f32 %v885_v40, %v807_v41 }
 0x3d6   :  { %v1124_v45 = vmul.f32 -1.442695, %v896_v43 }
 0x3d8   :  { %1307 = vpow2.f32 %v1124_v45 }
 0x3d9   :  { %1309 = vtanh.f32 %v897_v46 }
 0x3dd   :  { %v1304_v47 = vpop.eup %1303 }
 0x3de   :  { %v1306_v48 = vpop.eup %1305  ;;  %v908_v49 = vadd.f32 1.0, %v1304_v47  ;;  %v529_v47 = vlaneseq }
 0x3df   :  { %v907_v50 = vadd.f32 1.0, %v1306_v48 }
 0x3e0   :  { %1311 = vrcp.f32 %v908_v49  ;;  %v530_v48 = vand.u32 127, %v529_v47  ;;  %v670_v49 = vpop.xlane.xlu0 %669 }
 0x3e1   :  { %1313 = vrcp.f32 %v907_v50  ;;  %v801_v50 = vpop.xlane.xlu1 %800 }
 0x3e2   :  { %v1308_v51 = vpop.eup %1307  ;;  %vm802_vm2 = vcmp.eq.s32.totalorder %v530_v48, 1  ;;  %vm671_vm3 = vcmp.eq.s32.totalorder %v530_v48, 0  ;;  %vm933_vm4 = vcmp.eq.s32.totalorder %v530_v48, 2  ;;  %vm1064_vm5 = vcmp.eq.s32.totalorder %v530_v48, 3 }
 0x3e3   :  { %v1310_v52 = vpop.eup %1309  ;;  %v909_v56 = vadd.f32 1.0, %v1308_v51 }
 0x3e5   :  { %1315 = vrcp.f32 %v909_v56 }
 0x3ea   :  { %v1312_v53 = vpop.eup %1311 }
 0x3eb   :  { %v1314_v54 = vpop.eup %1313  ;;  %v917_v55 = vmul.f32 %v1312_v53, %v788_v14 }
 0x3ec   :  { %v918_v57 = vmul.f32 %v1314_v54, %v1310_v52  ;;  %v672_v52 = vsel %vm671_vm3, %v670_v49, 0.0 }
 0x3ee   :  { %v919_v58 = vadd.f32 %v918_v57, %v917_v55 }
 0x3ef   :  { %v1316_v59 = vpop.eup %1315 }
 0x3f0   :  { %1317 = vtanh.f32 %v919_v58 }
 0x3fa   :  { %v1318_v60 = vpop.eup %1317 }
 0x3fb   :  { %v921_v61 = vmul.f32 %v1318_v60, %v1316_v59 }
 0x3fd   :  { %v922_v62 = vmul.f32 %v921_v61, %v1499_v42  ;;  %1250 = vmatprep.subr.mxu1 %v921_v61 }
 0x3fe   :  { %1251 = vmatpush3.msra.mxu1 %v921_v61 }
 0x3ff   :  { %1253 = vmatmul.mubr.msk.f32.vlgmr.msra.gmra.mrb[16].mxu1 %vm160_vm1, %v1451_v34  ;;  %v923_v63 = vsel %vm38_vm0, %v922_v62, 0.0 }
 0x400   :  { %1255 = vmatprep.mubr.msk.f32.mxu1 %vm160_vm1, %v1458_v35  ;;  %v924_v33 = vrot.slane %v923_v63, 4 }
 0x402   :  { %v925_v0 = vadd.f32 %v924_v33, %v923_v63 }
 0x403   :  { %1256 = vmatmul.mubr.msk.f32.gmra.mrb[18].mxu1 %vm160_vm1, %v1469_v36  ;;  %v938_v36 = vld [vmem:[#allocation2 + $0x70] sm:$0xff] }
 0x404   :  { %v926_v1 = vrot.slane %v925_v0, 2 }
 0x406   :  { %v927_v2 = vadd.f32 %v926_v1, %v925_v0 }
 0x408   :  { %v928_v3 = vrot.slane %v927_v2, 1 }
 0x40a   :  { %v929_v4 = vadd.f32 %v928_v3, %v927_v2 }
 0x40c   :  { %v930_v5 = vsel %vm38_vm0, %v929_v4, 0.0 }
 0x40d   :  { %931 = vadd.xlane.f32.xlu0 %v930_v5 }
 0x49a   :  { %v932_v51 = vpop.xlane.xlu0 %931 }
 0x49b   :  { %v934_v53 = vsel %vm933_vm4, %v932_v51, 0.0 }
 0x4d2   :  { %v1254_v7 = vpop.f32.mrb[16].mxu1 }
 0x4d3   :  { %v1026_v34 = vadd.f32 %v1254_v7, %v937_v6  ;;  %v1006_v9 = vpop.f32.mrb[17].mxu1 }
 0x4d4   :  { %v1025_v10 = vadd.f32 %v1006_v9, %v936_v8 }
 0x4d5   :  { %v1130_v11 = vmul.f32 -1.442695, %v1026_v34 }
 0x4d6   :  { %v1129_v35 = vmul.f32 -1.442695, %v1025_v10  ;;  %v1257_v12 = vpop.f32.mrb[18].mxu1 }
 0x4d7   :  { %1319 = vpow2.f32 %v1130_v11  ;;  %v1016_v13 = vpop.f32.mrb[19].mxu1  ;;  %v1028_v17 = vadd.f32 %v1257_v12, %v939_v15 }
 0x4d8   :  { %1321 = vpow2.f32 %v1129_v35  ;;  %v1027_v14 = vadd.f32 %v1016_v13, %v938_v36 }
 0x4da   :  { %v1131_v16 = vmul.f32 -1.442695, %v1027_v14 }
 0x4dc   :  { %1323 = vpow2.f32 %v1131_v16 }
 0x4dd   :  { %1325 = vtanh.f32 %v1028_v17 }
 0x4e1   :  { %v1320_v18 = vpop.eup %1319 }
 0x4e2   :  { %v1322_v19 = vpop.eup %1321  ;;  %v1039_v20 = vadd.f32 1.0, %v1320_v18 }
 0x4e3   :  { %v1038_v21 = vadd.f32 1.0, %v1322_v19 }
 0x4e4   :  { %1327 = vrcp.f32 %v1039_v20 }
 0x4e5   :  { %1329 = vrcp.f32 %v1038_v21 }
 0x4e6   :  { %v1324_v22 = vpop.eup %1323 }
 0x4e7   :  { %v1326_v23 = vpop.eup %1325  ;;  %v1040_v27 = vadd.f32 1.0, %v1324_v22 }
 0x4e9   :  { %1331 = vrcp.f32 %v1040_v27 }
 0x4ee   :  { %v1328_v24 = vpop.eup %1327 }
 0x4ef   :  { %v1330_v25 = vpop.eup %1329  ;;  %v1048_v26 = vmul.f32 %v1328_v24, %v919_v58 }
 0x4f0   :  { %v1049_v28 = vmul.f32 %v1330_v25, %v1326_v23 }
 0x4f2   :  { %v1050_v29 = vadd.f32 %v1049_v28, %v1048_v26 }
 0x4f3   :  { %v1332_v30 = vpop.eup %1331 }
 0x4f4   :  { %1333 = vtanh.f32 %v1050_v29 }
 0x4fe   :  { %v1334_v31 = vpop.eup %1333 }
 0x4ff   :  { %v1052_v32 = vmul.f32 %v1334_v31, %v1332_v30 }
 0x501   :  { %v1053_v37 = vmul.f32 %v1052_v32, %v1499_v42  ;;  %v803_v42 = vsel %vm802_vm2, %v801_v50, 0.0 }
 0x502   :  { %v804_v54 = vadd.f32 %v803_v42, %v672_v52 }
 0x503   :  { %v1054_v38 = vsel %vm38_vm0, %v1053_v37, 0.0 }
 0x504   :  { %v1055_v39 = vrot.slane %v1054_v38, 4  ;;  %v935_v55 = vadd.f32 %v934_v53, %v804_v54 }
 0x506   :  { %v1056_v40 = vadd.f32 %v1055_v39, %v1054_v38 }
 0x508   :  { %v1057_v41 = vrot.slane %v1056_v40, 2 }
 0x50a   :  { %v1058_v43 = vadd.f32 %v1057_v41, %v1056_v40 }
 0x50c   :  { %v1059_v44 = vrot.slane %v1058_v43, 1 }
 0x50e   :  { %v1060_v45 = vadd.f32 %v1059_v44, %v1058_v43 }
 0x510   :  { %v1061_v46 = vsel %vm38_vm0, %v1060_v45, 0.0 }
 0x511   :  { %1062 = vadd.xlane.f32.xlu0 %v1061_v46 }
 0x59e   :  { %v1063_v56 = vpop.xlane.xlu0 %1062 }
 0x59f   :  { %v1065_v57 = vsel %vm1064_vm5, %v1063_v56, 0.0 }
 0x5a0   :  { %v1066_v58 = vadd.f32 %v1065_v57, %v935_v55 }
 0x5a2   :  { %1068 = vst.msk [vmem:[#allocation3] sm:$0x1] %vm1067_vm6, %v1066_v58 }
 0x5a3   :  { %1346 = shalt.err (!%p1343_p4)
}
 0x5a4   :  { %s1347_s29 = scalar_lea.hbm %s1547_s2, 16 }
 0x5a5   :  { %p1348_p5 = scmp.ne.s32.totalorder %s1547_s2, %s1347_s29  ;;  %p1351_p6 = scmp.lt.u32.totalorder %s1347_s29, %s1547_s2 }
 0x5a7   :  { %p1353_p7 = pnand %p1351_p6, %p1348_p5 }
 0x5a9   :  { %1356 = shalt.err (!%p1353_p7)
}
 0x5aa   :  { %1078 = dma.vmem_to_hbm [thread:$0]  %s1076_s24, 16, %s1547_s2, [#allocation4]  }
 0x5ab   :  { %1357 = dma.done.wait [#allocation4], 16  }
 0x5ac   :  { %1358 = vsyncadd [#allocation4], 4294967280 }
 0x5ad   :  { %1082 = vsyncpa [#allocation4], 1 }

</bundles_post_ra>
